<compile_context>
chip_gen: v5e
topology: v5e:2x2
jax: 0.10.0
libtpu: 0.0.40
codegen_flags: <defaults>
</compile_context>

<pallas_src>
import jax
import jax.numpy as jnp
from jax.experimental import pallas as pl
from jax.experimental.pallas import tpu as pltpu


_MAX_OUTSTANDING_DMAS = 4   # 2-4 in-flight HBM->HBM DMAs is enough to hide issue latency.
_MIN_CHUNK_BYTES = 1 << 20  # below ~1 MiB a single DMA already saturates.


def _make_hbm_copy_kernel(chunks):
    """Gridless kernel: copy static (start, size) chunks along axis 0 from the
    input HBM ref to the output HBM ref via direct HBM->HBM async DMAs."""

    def kernel(x_hbm, o_hbm, sems):
        copies = []
        for c, (start, size) in enumerate(chunks):
            cp = pltpu.make_async_copy(
                x_hbm.at[pl.ds(start, size)],
                o_hbm.at[pl.ds(start, size)],
                sems.at[c],
            )
            cp.start()
            copies.append(cp)
        # All DMAs are in flight; now block on each.
        for cp in copies:
            cp.wait()

    return kernel


def _pallas_hbm_copy(x):
    """Explicitly materialized identity: copy x into a NEW HBM buffer."""
    x = jnp.asarray(x)
    if x.size == 0:
        return x  # nothing to move

    orig_shape = x.shape
    if x.ndim == 0:
        x = x.reshape(1)  # metadata-only; gives us a leading axis to DMA-slice

    d0 = x.shape[0]
    nbytes = x.size * jnp.dtype(x.dtype).itemsize
    num_chunks = int(min(_MAX_OUTSTANDING_DMAS, max(1, nbytes // _MIN_CHUNK_BYTES), d0))

    # Split the leading axis into num_chunks nearly-equal static chunks.
    base, rem = divmod(d0, num_chunks)
    chunks = []
    start = 0
    for c in range(num_chunks):
        size = base + (1 if c < rem else 0)
        if size > 0:
            chunks.append((start, size))
        start += size
    chunks = tuple(chunks)

    y = pl.pallas_call(
        _make_hbm_copy_kernel(chunks),
        out_shape=jax.ShapeDtypeStruct(x.shape, x.dtype),
        in_specs=[pl.BlockSpec(memory_space=pl.ANY)],   # stay in HBM, no auto-DMA
        out_specs=pl.BlockSpec(memory_space=pl.ANY),    # stay in HBM, no auto-DMA
        scratch_shapes=[pltpu.SemaphoreType.DMA((len(chunks),))],
    )(x)
    return y.reshape(orig_shape)


class EmptyPallas:
    """JAX/Pallas equivalent of the PyTorch `Empty` module (no parameters).

    Default behavior is a true pass-through (no kernel, no HBM traffic) — the
    optimal implementation of this module.  Set use_pallas_copy=True to run an
    explicit HBM->HBM DMA copy kernel that materializes an independent output
    buffer.
    """

    def __init__(self, *args, use_pallas_copy=False, **kwargs):
        # Empty.__init__ ignores all args/kwargs and registers no parameters.
        self._use_pallas_copy = use_pallas_copy

    def _fwd(self, x):
        x = jnp.asarray(x)
        if self._use_pallas_copy:
            return _pallas_hbm_copy(x)
        return x  # zero-cost identity: the correct "kernel" for this module

    def __call__(self, *args, **kwargs):
        if len(args) == 1:
            return self._fwd(args[0])
        elif len(args) == 0:
            return None
        return tuple(self._fwd(a) for a in args)


if __name__ == "__main__":
    key = jax.random.PRNGKey(0)
    k1, k2, k3 = jax.random.split(key, 3)

    x = jax.random.normal(k1, (2, 4, 16, 16), dtype=jnp.float32)   # batch=2, channels=4, spatial=16
    z = jax.random.normal(k2, (2, 8, 32), dtype=jnp.float32)       # batch=2, seq=8, hidden=32
    r = jax.random.normal(k3, (3, 5, 7), dtype=jnp.float32)        # ragged flat size (105 % 128 != 0)

    # --- Default (fast) path: pure pass-through ---
    mod = EmptyPallas()

    y = mod(x)
    y = jax.block_until_ready(y)
    assert y.shape == x.shape and y.dtype == x.dtype
    assert bool(jnp.array_equal(y, x))

    assert mod() is None

    out = mod(x, z)
    out = jax.block_until_ready(out)
    assert isinstance(out, tuple) and len(out) == 2
    assert bool(jnp.array_equal(out[0], x)) and bool(jnp.array_equal(out[1], z))

    # --- Explicit Pallas HBM->HBM DMA copy path ---
    mod_copy = EmptyPallas(use_pallas_copy=True)

    yk = jax.block_until_ready(mod_copy(x))
    assert yk.shape == x.shape and yk.dtype == x.dtype
    assert bool(jnp.array_equal(yk, x))

    rk = jax.block_until_ready(mod_copy(r))   # ragged size also gets a real copy
    assert rk.shape == r.shape and bool(jnp.array_equal(rk, r))

    outk = mod_copy(x, z)
    outk = jax.block_until_ready(outk)
    assert isinstance(outk, tuple) and len(outk) == 2
    assert bool(jnp.array_equal(outk[0], x)) and bool(jnp.array_equal(outk[1], z))

    print("KERNEL_OK")
</pallas_src>

<mosaic_0001>
module attributes {stable_mosaic.version = 11 : i64} {
  func.func @kernel(%arg0: memref<2x4x16x16xf32, #tpu.memory_space<any>>, %arg1: memref<2x4x16x16xf32, #tpu.memory_space<any>>, %arg2: memref<1x!tpu.dma_semaphore, #tpu.memory_space<semaphore_mem>>) attributes {dimension_semantics = [], scalar_prefetch = 0 : i64, scratch_operands = 1 : i64, tpu.core_type = #tpu.core_type<tc>} {
    %c0_i32 = arith.constant 0 : i32
    %c0_i32_0 = arith.constant 0 : i32
    %c0_i32_1 = arith.constant 0 : i32
    %c0_i32_2 = arith.constant 0 : i32
    %c0_i32_3 = arith.constant 0 : i32
    %0 = tpu.memref_slice %arg0[%c0_i32_0, %c0_i32_1, %c0_i32_2, %c0_i32_3] : memref<2x4x16x16xf32, #tpu.memory_space<any>> -> memref<2x4x16x16xf32, #tpu.memory_space<any>>
    %c0_i32_4 = arith.constant 0 : i32
    %c0_i32_5 = arith.constant 0 : i32
    %c0_i32_6 = arith.constant 0 : i32
    %c0_i32_7 = arith.constant 0 : i32
    %1 = tpu.memref_slice %arg1[%c0_i32_4, %c0_i32_5, %c0_i32_6, %c0_i32_7] : memref<2x4x16x16xf32, #tpu.memory_space<any>> -> memref<2x4x16x16xf32, #tpu.memory_space<any>>
    %2 = tpu.memref_slice %arg2[%c0_i32] : memref<1x!tpu.dma_semaphore, #tpu.memory_space<semaphore_mem>> -> memref<1x!tpu.dma_semaphore, #tpu.memory_space<semaphore_mem>>
    %3 = tpu.memref_squeeze %2 : memref<1x!tpu.dma_semaphore, #tpu.memory_space<semaphore_mem>> -> memref<!tpu.dma_semaphore, #tpu.memory_space<semaphore_mem>>
    tpu.enqueue_dma source(%0 : memref<2x4x16x16xf32, #tpu.memory_space<any>>) target(%1 : memref<2x4x16x16xf32, #tpu.memory_space<any>>) target_semaphore(%3 : memref<!tpu.dma_semaphore, #tpu.memory_space<semaphore_mem>>)
    %c0_i32_8 = arith.constant 0 : i32
    %c0_i32_9 = arith.constant 0 : i32
    %c0_i32_10 = arith.constant 0 : i32
    %c0_i32_11 = arith.constant 0 : i32
    %c0_i32_12 = arith.constant 0 : i32
    %4 = tpu.memref_slice %arg0[%c0_i32_9, %c0_i32_10, %c0_i32_11, %c0_i32_12] : memref<2x4x16x16xf32, #tpu.memory_space<any>> -> memref<2x4x16x16xf32, #tpu.memory_space<any>>
    %c0_i32_13 = arith.constant 0 : i32
    %c0_i32_14 = arith.constant 0 : i32
    %c0_i32_15 = arith.constant 0 : i32
    %c0_i32_16 = arith.constant 0 : i32
    %5 = tpu.memref_slice %arg1[%c0_i32_13, %c0_i32_14, %c0_i32_15, %c0_i32_16] : memref<2x4x16x16xf32, #tpu.memory_space<any>> -> memref<2x4x16x16xf32, #tpu.memory_space<any>>
    %6 = tpu.memref_slice %arg2[%c0_i32_8] : memref<1x!tpu.dma_semaphore, #tpu.memory_space<semaphore_mem>> -> memref<1x!tpu.dma_semaphore, #tpu.memory_space<semaphore_mem>>
    %7 = tpu.memref_squeeze %6 : memref<1x!tpu.dma_semaphore, #tpu.memory_space<semaphore_mem>> -> memref<!tpu.dma_semaphore, #tpu.memory_space<semaphore_mem>>
    tpu.wait_dma2 semaphore(%7 : memref<!tpu.dma_semaphore, #tpu.memory_space<semaphore_mem>>) src(%4 : memref<2x4x16x16xf32, #tpu.memory_space<any>>) dst(%5 : memref<2x4x16x16xf32, #tpu.memory_space<any>>)
    return
  }
}

</mosaic_0001>

<bundles_post_ra>
// kernel: tpu_custom_call.1
= control target key start
LH: loop header
LB: loop body
LE: loop exit
PB: predicated region body
PF: predicated region fallthrough
CT: control target
= control target key end

     0   :  { %s34_s12 = smov [#allocation2]   ;;  %s35_s13 = smov [#allocation3]   ;;  %s53_s0 = inlined_call_operand.hbm [shape: f32[2,4,16,16], index: 0, kind: input, shape index: {}]   ;;  %s54_s1 = inlined_call_operand.hbm [shape: f32[2,4,16,16], index: 1, kind: output, shape index: {}]  }
   0x1   :  { %s10_s8 = sshll.u32 %s53_s0, 4  ;;  %s12_s11 = sshll.u32 %s54_s1, 4  ;;  %s11_s8 = int_to_ptr.hbm [resolvable:$true] %s10_s8  ;;  %s13_s11 = int_to_ptr.hbm [resolvable:$true] %s12_s11 }
   0x2   :  { %s36_s14 = smov 0  }
   0x3   :  { %16 = dma.general %s11_s8, 2048, %s13_s11, %s34_s12, %s35_s13, [#allocation4], %s36_s14, 0  }
   0x4   :  { %32 = dma.done.wait [#allocation2], 2048 }
   0x5   :  { %33 = vsyncadd [#allocation2], 4294965248 }
   0x6   :  { %22 = vsyncmov [#allocation2] }
   0x9   :  { %s23_s15 = vpop.sfrf %22 }
   0xa   :  { %p28_p0 = scmp.ne.s32.totalorder %s23_s15, 0 }
   0xc   :  { %27 = shalt.err (%p28_p0)  }

</bundles_post_ra>
